<compile_context>
chip_gen: v7x
topology: tpu7x:2x2x1
jax: 0.10.0
libtpu: 0.0.40
codegen_flags: <defaults>
</compile_context>

<pallas_src>
import math

import jax
import jax.numpy as jnp
from jax import lax
from jax.experimental import pallas as pl
from jax.experimental.pallas import tpu as pltpu


def _lstmon_kernel(z_ref, w_ref, b_ref, tri_ref, c_ref,
                   h_out_ref, c_out_ref, pre_ref):
    k = pl.program_id(1)
    nk = pl.num_programs(1)
    H = h_out_ref.shape[1]
    tb = h_out_ref.shape[0]

    @pl.when(k == 0)
    def _():
        # Start the f32 accumulator from the broadcast bias -> bias add is fused.
        pre_ref[...] = jnp.broadcast_to(b_ref[...], pre_ref.shape)

    # (tb, tk) @ (tk, 6H): lhs-last x rhs-first contraction -> MXU-native, no transpose.
    # Operands may be bf16; accumulation is always f32.
    pre_ref[...] += lax.dot_general(
        z_ref[...], w_ref[...],
        dimension_numbers=(((1,), (0,)), ((), ())),
        preferred_element_type=jnp.float32)

    @pl.when(k == nk - 1)
    def _():
        pre = pre_ref[...]                                   # (tb, 6H) f32
        i = jax.nn.sigmoid(pre[:, 0 * H:1 * H])
        f = jax.nn.sigmoid(pre[:, 1 * H:2 * H])
        g = jnp.tanh(pre[:, 2 * H:3 * H])
        o = jax.nn.sigmoid(pre[:, 3 * H:4 * H])

        # Fused double-cumax: one softmax over (2*tb, H), one tri matmul, then split.
        logits = jnp.concatenate([pre[:, 4 * H:5 * H], pre[:, 5 * H:6 * H]], axis=0)
        m = jnp.max(logits, axis=-1, keepdims=True)
        e = jnp.exp(logits - m)
        p = e / jnp.sum(e, axis=-1, keepdims=True)           # softmax, f32
        # cumsum[b, j] = sum_{k<=j} p[b, k]  (tri[k, j] = 1 iff k <= j, hoisted input)
        cs = jnp.dot(p, tri_ref[...], preferred_element_type=jnp.float32)
        ff = cs[:tb]
        ii = 1.0 - cs[tb:]

        w = ff * ii
        f = f * w + (ff - w)
        i = i * w + (ii - w)
        c_new = f * c_ref[...].astype(jnp.float32) + i * g
        h_new = o * jnp.tanh(c_new)
        h_out_ref[...] = h_new.astype(h_out_ref.dtype)
        c_out_ref[...] = c_new.astype(c_out_ref.dtype)


def _vmem_cap_bytes():
    """~80% of physical per-core VMEM; conservative fallback if the query fails."""
    try:
        phys = pltpu.get_tpu_info().vmem_capacity_bytes
    except Exception:
        phys = 64 * 1024 * 1024            # v7x-safe fallback
    return int(phys * 0.8)


def _pick_batch_tile(B):
    """Cap tile at 256 and ensure >= 2 tiles whenever B >= 16 so the 'parallel'
    grid axis can shard across both v7x TensorCores (harmless on v5e/v6e)."""
    if B < 16:
        return B
    cap = min(256, B // 2)
    best = None
    for tb in range(cap, 0, -1):
        if B % tb == 0:
            if tb % 8 == 0:
                return tb
            if best is None:
                best = tb
    return best if best is not None else B


def _pick_k_tile(K, H, w_itemsize, vmem_budget):
    """Prefer tk == K (weight block index constant -> one-shot HBM weight fetch).
    Only tile K if the double-buffered weight slab does not fit ~60% of the budget."""
    def wbytes(tk):
        return 2 * tk * 6 * H * w_itemsize      # double-buffered weight tile
    if wbytes(K) <= 0.6 * vmem_budget:
        return K
    for cand in (2048, 1024, 512, 384, 256, 128):
        if K % cand == 0 and wbytes(cand) <= 0.6 * vmem_budget:
            return cand
    for cand in range(min(K, 4096), 0, -1):      # last resort: any fitting divisor
        if K % cand == 0 and wbytes(cand) <= 0.6 * vmem_budget:
            return cand
    return K


def lstmon_cell_forward(x, hx, w_ih, w_hh, bias=None, *, mxu_dtype=jnp.bfloat16):
    """Pallas forward of LSTMONCell.

    x: (B, I); hx = (h, c) each (B, H); w_ih: (6H, I); w_hh: (6H, H);
    bias: optional (6H,).  Returns (h', c').

    mxu_dtype: dtype of the GEMM operands (bf16 by default for ~2x HBM bandwidth;
    accumulation and the gate epilogue are always f32).  Use jnp.float32 for
    bit-fidelity with the f32 PyTorch reference.
    """
    h, c = hx
    B, I = x.shape
    Bh, H = h.shape
    assert Bh == B and c.shape == (B, H)
    assert w_ih.shape == (6 * H, I)
    assert w_hh.shape == (6 * H, H)

    K = I + H
    # Fused + pre-transposed GEMM operands:  pre = [x|h] @ [W_ih|W_hh]^T + bias.
    # TODO(synk): in a recurrent scan, hoist w_t / tri outside the time loop.
    z = jnp.concatenate([x, h], axis=1).astype(mxu_dtype)              # (B, K)
    w_t = jnp.concatenate([w_ih, w_hh], axis=1).T.astype(mxu_dtype)    # (K, 6H)
    if bias is None:
        b2 = jnp.zeros((1, 6 * H), dtype=jnp.float32)
    else:
        b2 = bias.reshape(1, 6 * H).astype(jnp.float32)
    # Hoisted upper-triangular ones matrix: tri[k, j] = 1 iff k <= j.
    tri = (jnp.arange(H)[:, None] <= jnp.arange(H)[None, :]).astype(jnp.float32)

    vmem_cap = _vmem_cap_bytes()                 # ~51 MiB v7x, ~102 MiB v5e/v6e
    w_itemsize = jnp.dtype(mxu_dtype).itemsize

    tb = _pick_batch_tile(B)
    tk = _pick_k_tile(K, H, w_itemsize, vmem_cap)
    assert B % tb == 0 and K % tk == 0
    nb, nk = B // tb, K // tk

    # VMEM budget estimate (now including tri input + epilogue temporaries).
    est = (2 * tb * tk * w_itemsize              # z tiles (double-buffered)
           + 2 * tk * 6 * H * w_itemsize         # weight tiles (double-buffered)
           + 2 * H * H * 4                       # tri input
           + tb * 6 * H * 4                      # pre accumulator scratch
           + 2 * 3 * tb * H * 4                  # c in + h/c out (double-buffered)
           + 2 * 6 * H * 4                       # bias
           + 12 * tb * H * 4)                    # gate / cumax temporaries
    vmem_limit = int(min(max(int(1.5 * est), 32 * 1024 * 1024), vmem_cap))

    cost = pl.CostEstimate(
        flops=2 * B * 6 * H * K + 2 * (2 * B) * H * H + 30 * B * H,
        transcendentals=8 * B * H,
        bytes_accessed=(w_itemsize * (B * K + 6 * H * K)
                        + 4 * (3 * B * H + 6 * H + H * H)),
    )

    h_out, c_out = pl.pallas_call(
        _lstmon_kernel,
        out_shape=(jax.ShapeDtypeStruct((B, H), h.dtype),
                   jax.ShapeDtypeStruct((B, H), c.dtype)),
        grid_spec=pltpu.PrefetchScalarGridSpec(
            num_scalar_prefetch=0,
            grid=(nb, nk),
            in_specs=[
                pl.BlockSpec((tb, tk), lambda b, k: (b, k)),      # z = [x | h]
                pl.BlockSpec((tk, 6 * H), lambda b, k: (k, 0)),   # fused weight (K, 6H)
                pl.BlockSpec((1, 6 * H), lambda b, k: (0, 0)),    # bias
                pl.BlockSpec((H, H), lambda b, k: (0, 0)),        # tri (hoisted)
                pl.BlockSpec((tb, H), lambda b, k: (b, 0)),       # c_prev
            ],
            out_specs=[
                pl.BlockSpec((tb, H), lambda b, k: (b, 0)),       # h_new
                pl.BlockSpec((tb, H), lambda b, k: (b, 0)),       # c_new
            ],
            scratch_shapes=[pltpu.VMEM((tb, 6 * H), jnp.float32)],
        ),
        compiler_params=pltpu.CompilerParams(
            dimension_semantics=("parallel", "arbitrary"),
            vmem_limit_bytes=vmem_limit,
        ),
        cost_estimate=cost,
    )(z, w_t, b2, tri, c)

    return h_out, c_out


def _lstmon_reference(x, h, c, w_ih, w_hh, bias, gemm_dtype=jnp.float32):
    """Plain-JAX reference of the PyTorch forward (optionally with GEMM operands
    rounded to gemm_dtype to match the kernel's MXU input precision)."""
    H = h.shape[1]
    xq = x.astype(gemm_dtype).astype(jnp.float32)
    hq = h.astype(gemm_dtype).astype(jnp.float32)
    wi = w_ih.astype(gemm_dtype).astype(jnp.float32)
    wh = w_hh.astype(gemm_dtype).astype(jnp.float32)
    pre = xq @ wi.T + hq @ wh.T
    if bias is not None:
        pre = pre + bias[None, :]
    i = jax.nn.sigmoid(pre[:, 0 * H:1 * H])
    f = jax.nn.sigmoid(pre[:, 1 * H:2 * H])
    g = jnp.tanh(pre[:, 2 * H:3 * H])
    o = jax.nn.sigmoid(pre[:, 3 * H:4 * H])
    ff = jnp.cumsum(jax.nn.softmax(pre[:, 4 * H:5 * H], axis=-1), axis=-1)
    ii = 1.0 - jnp.cumsum(jax.nn.softmax(pre[:, 5 * H:6 * H], axis=-1), axis=-1)
    w = ff * ii
    f = f * w + (ff - w)
    i = i * w + (ii - w)
    c_new = f * c + i * g
    h_new = o * jnp.tanh(c_new)
    return h_new, c_new


if __name__ == "__main__":
    batch, input_size, hidden_size = 8, 64, 128

    key = jax.random.PRNGKey(0)
    kx, kh, kc, kwi, kwh, kb = jax.random.split(key, 6)

    # reset_parameters(): uniform(-stdv, stdv), stdv = 1/sqrt(hidden_size)
    stdv = 1.0 / math.sqrt(hidden_size)
    x = jax.random.normal(kx, (batch, input_size), dtype=jnp.float32)
    h0 = jax.random.normal(kh, (batch, hidden_size), dtype=jnp.float32)
    c0 = jax.random.normal(kc, (batch, hidden_size), dtype=jnp.float32)
    w_ih = jax.random.uniform(kwi, (6 * hidden_size, input_size),
                              dtype=jnp.float32, minval=-stdv, maxval=stdv)
    w_hh = jax.random.uniform(kwh, (6 * hidden_size, hidden_size),
                              dtype=jnp.float32, minval=-stdv, maxval=stdv)
    bias = jax.random.uniform(kb, (6 * hidden_size,),
                              dtype=jnp.float32, minval=-stdv, maxval=stdv)

    # 1) Full-f32 kernel: bit-level check against the f32 reference.
    h_f32, c_f32 = lstmon_cell_forward(x, (h0, c0), w_ih, w_hh, bias,
                                       mxu_dtype=jnp.float32)
    h_f32, c_f32 = jax.block_until_ready((h_f32, c_f32))
    h_ref, c_ref = _lstmon_reference(x, h0, c0, w_ih, w_hh, bias)
    assert h_f32.shape == (batch, hidden_size) and c_f32.shape == (batch, hidden_size)
    assert jnp.allclose(h_f32, h_ref, atol=1e-4, rtol=1e-4)
    assert jnp.allclose(c_f32, c_ref, atol=1e-4, rtol=1e-4)

    # 2) bf16-GEMM kernel (default, ~2x weight bandwidth):
    #    tight check vs a matched-precision reference, loose check vs full f32.
    h1, c1 = lstmon_cell_forward(x, (h0, c0), w_ih, w_hh, bias)
    h1, c1 = jax.block_until_ready((h1, c1))
    h_m, c_m = _lstmon_reference(x, h0, c0, w_ih, w_hh, bias,
                                 gemm_dtype=jnp.bfloat16)
    assert jnp.allclose(h1, h_m, atol=1e-3, rtol=1e-3)
    assert jnp.allclose(c1, c_m, atol=1e-3, rtol=1e-3)
    assert jnp.allclose(h1, h_ref, atol=3e-2, rtol=3e-2)
    assert jnp.allclose(c1, c_ref, atol=3e-2, rtol=3e-2)

    print("KERNEL_OK")
</pallas_src>

<mosaic_0001>
module attributes {stable_mosaic.version = 11 : i64} {
  func.func @_lstmon_kernel(%arg0: i32, %arg1: i32, %arg2: memref<8x192xf32, #tpu.memory_space<vmem>>, %arg3: memref<192x768xf32, #tpu.memory_space<vmem>>, %arg4: memref<1x768xf32, #tpu.memory_space<vmem>>, %arg5: memref<128x128xf32, #tpu.memory_space<vmem>>, %arg6: memref<8x128xf32, #tpu.memory_space<vmem>>, %arg7: memref<8x128xf32, #tpu.memory_space<vmem>>, %arg8: memref<8x128xf32, #tpu.memory_space<vmem>>, %arg9: memref<8x768xf32, #tpu.memory_space<vmem>>) attributes {dimension_semantics = [#tpu.dimension_semantics<parallel>, #tpu.dimension_semantics<arbitrary>], iteration_bounds = array<i64: 1, 1>, scalar_prefetch = 0 : i64, scratch_operands = 1 : i64, tpu.core_type = #tpu.core_type<tc>, window_params = [{transform_indices = @transform_0, window_bounds = array<i64: 8, 192>}, {transform_indices = @transform_1, window_bounds = array<i64: 192, 768>}, {pipeline_mode = #tpu.pipeline_mode<synchronous>, transform_indices = @transform_2, window_bounds = array<i64: 1, 768>}, {pipeline_mode = #tpu.pipeline_mode<synchronous>, transform_indices = @transform_3, window_bounds = array<i64: 128, 128>}, {transform_indices = @transform_4, window_bounds = array<i64: 8, 128>}, {transform_indices = @transform_5, window_bounds = array<i64: 8, 128>}, {transform_indices = @transform_6, window_bounds = array<i64: 8, 128>}]} {
    %c0_i32 = arith.constant 0 : i32
    %0 = arith.cmpi eq, %arg1, %c0_i32 : i32
    %1 = arith.extui %0 : i1 to i32
    %c0_i32_0 = arith.constant 0 : i32
    %2 = arith.cmpi ne, %1, %c0_i32_0 : i32
    scf.if %2 {
      %c0_10 = arith.constant 0 : index
      %c0_11 = arith.constant 0 : index
      %12 = vector.load %arg4[%c0_10, %c0_11] : memref<1x768xf32, #tpu.memory_space<vmem>>, vector<1x768xf32>
      %13 = vector.shape_cast %12 : vector<1x768xf32> to vector<1x768xf32>
      %14 = vector.broadcast %13 : vector<1x768xf32> to vector<8x768xf32>
      %c0_12 = arith.constant 0 : index
      %c0_13 = arith.constant 0 : index
      %15 = vector.load %arg9[%c0_12, %c0_13] : memref<8x768xf32, #tpu.memory_space<vmem>>, vector<8x768xf32>
      tpu.vector_store %arg9[%c0_12, %c0_13], %14 {strides = array<i32>} : memref<8x768xf32, #tpu.memory_space<vmem>>, vector<8x768xf32>,
    } else {
    }
    %c0 = arith.constant 0 : index
    %c0_1 = arith.constant 0 : index
    %3 = vector.load %arg9[%c0, %c0_1] : memref<8x768xf32, #tpu.memory_space<vmem>>, vector<8x768xf32>
    %c0_2 = arith.constant 0 : index
    %c0_3 = arith.constant 0 : index
    %4 = vector.load %arg2[%c0_2, %c0_3] : memref<8x192xf32, #tpu.memory_space<vmem>>, vector<8x192xf32>
    %c0_4 = arith.constant 0 : index
    %c0_5 = arith.constant 0 : index
    %5 = vector.load %arg3[%c0_4, %c0_5] : memref<192x768xf32, #tpu.memory_space<vmem>>, vector<192x768xf32>
    %cst = arith.constant dense<0.000000e+00> : vector<8x768xf32>
    %6 = tpu.matmul %4, %5, %cst {dimension_numbers = #tpu.dot_dimension_numbers<[1], [0], [0], [1], [0, 0, 1, 1], [], []>} : vector<8x192xf32>, vector<192x768xf32>, vector<8x768xf32> -> vector<8x768xf32>
    %7 = arith.addf %3, %6 : vector<8x768xf32>
    %c0_6 = arith.constant 0 : index
    %c0_7 = arith.constant 0 : index
    %8 = vector.load %arg9[%c0_6, %c0_7] : memref<8x768xf32, #tpu.memory_space<vmem>>, vector<8x768xf32>
    tpu.vector_store %arg9[%c0_6, %c0_7], %7 {strides = array<i32>} : memref<8x768xf32, #tpu.memory_space<vmem>>, vector<8x768xf32>,
    %c0_i32_8 = arith.constant 0 : i32
    %9 = arith.cmpi eq, %arg1, %c0_i32_8 : i32
    %10 = arith.extui %9 : i1 to i32
    %c0_i32_9 = arith.constant 0 : i32
    %11 = arith.cmpi ne, %10, %c0_i32_9 : i32
    scf.if %11 {
      %c0_10 = arith.constant 0 : index
      %c0_11 = arith.constant 0 : index
      %12 = vector.load %arg9[%c0_10, %c0_11] : memref<8x768xf32, #tpu.memory_space<vmem>>, vector<8x768xf32>
      %13 = vector.extract_strided_slice %12 {offsets = [0, 0], sizes = [8, 128], strides = [1, 1]} : vector<8x768xf32> to vector<8x128xf32>
      %14 = arith.negf %13 : vector<8x128xf32>
      %15 = math.exp %14 : vector<8x128xf32>
      %cst_12 = arith.constant 1.000000e+00 : f32
      %16 = vector.broadcast %cst_12 : f32 to vector<8x128xf32>
      %17 = arith.addf %16, %15 : vector<8x128xf32>
      %18 = arith.divf %16, %17 : vector<8x128xf32>
      %19 = vector.extract_strided_slice %12 {offsets = [0, 128], sizes = [8, 128], strides = [1, 1]} : vector<8x768xf32> to vector<8x128xf32>
      %20 = arith.negf %19 : vector<8x128xf32>
      %21 = math.exp %20 : vector<8x128xf32>
      %cst_13 = arith.constant 1.000000e+00 : f32
      %22 = vector.broadcast %cst_13 : f32 to vector<8x128xf32>
      %23 = arith.addf %22, %21 : vector<8x128xf32>
      %24 = arith.divf %22, %23 : vector<8x128xf32>
      %25 = vector.extract_strided_slice %12 {offsets = [0, 256], sizes = [8, 128], strides = [1, 1]} : vector<8x768xf32> to vector<8x128xf32>
      %26 = math.tanh %25 : vector<8x128xf32>
      %27 = vector.extract_strided_slice %12 {offsets = [0, 384], sizes = [8, 128], strides = [1, 1]} : vector<8x768xf32> to vector<8x128xf32>
      %28 = arith.negf %27 : vector<8x128xf32>
      %29 = math.exp %28 : vector<8x128xf32>
      %cst_14 = arith.constant 1.000000e+00 : f32
      %30 = vector.broadcast %cst_14 : f32 to vector<8x128xf32>
      %31 = arith.addf %30, %29 : vector<8x128xf32>
      %32 = arith.divf %30, %31 : vector<8x128xf32>
      %33 = vector.extract_strided_slice %12 {offsets = [0, 512], sizes = [8, 128], strides = [1, 1]} : vector<8x768xf32> to vector<8x128xf32>
      %34 = vector.extract_strided_slice %12 {offsets = [0, 640], sizes = [8, 128], strides = [1, 1]} : vector<8x768xf32> to vector<8x128xf32>
      %35 = tpu.concatenate %33, %34 in 0 : vector<8x128xf32>, vector<8x128xf32> -> vector<16x128xf32>
      %cst_15 = arith.constant dense<0xFF800000> : vector<16xf32>
      %36 = vector.multi_reduction <maximumf>, %35, %cst_15 [1] : vector<16x128xf32> to vector<16xf32>
      %37 = vector.shape_cast %36 : vector<16xf32> to vector<16x1xf32>
      %38 = vector.broadcast %37 : vector<16x1xf32> to vector<16x128xf32>
      %39 = arith.subf %35, %38 : vector<16x128xf32>
      %40 = math.exp %39 : vector<16x128xf32>
      %cst_16 = arith.constant dense<0.000000e+00> : vector<16xf32>
      %41 = vector.multi_reduction <add>, %40, %cst_16 [1] : vector<16x128xf32> to vector<16xf32>
      %42 = vector.shape_cast %41 : vector<16xf32> to vector<16x1xf32>
      %43 = vector.broadcast %42 : vector<16x1xf32> to vector<16x128xf32>
      %44 = arith.divf %40, %43 : vector<16x128xf32>
      %c0_17 = arith.constant 0 : index
      %c0_18 = arith.constant 0 : index
      %45 = vector.load %arg5[%c0_17, %c0_18] : memref<128x128xf32, #tpu.memory_space<vmem>>, vector<128x128xf32>
      %cst_19 = arith.constant dense<0.000000e+00> : vector<16x128xf32>
      %46 = tpu.matmul %44, %45, %cst_19 {dimension_numbers = #tpu.dot_dimension_numbers<[1], [0], [0], [1], [0, 0, 1, 1], [], []>} : vector<16x128xf32>, vector<128x128xf32>, vector<16x128xf32> -> vector<16x128xf32>
      %47 = vector.extract_strided_slice %46 {offsets = [0, 0], sizes = [8, 128], strides = [1, 1]} : vector<16x128xf32> to vector<8x128xf32>
      %48 = vector.extract_strided_slice %46 {offsets = [8, 0], sizes = [8, 128], strides = [1, 1]} : vector<16x128xf32> to vector<8x128xf32>
      %cst_20 = arith.constant 1.000000e+00 : f32
      %49 = vector.broadcast %cst_20 : f32 to vector<8x128xf32>
      %50 = arith.subf %49, %48 : vector<8x128xf32>
      %51 = arith.mulf %47, %50 : vector<8x128xf32>
      %52 = arith.mulf %24, %51 : vector<8x128xf32>
      %53 = arith.subf %47, %51 : vector<8x128xf32>
      %54 = arith.addf %52, %53 : vector<8x128xf32>
      %55 = arith.mulf %18, %51 : vector<8x128xf32>
      %56 = arith.subf %50, %51 : vector<8x128xf32>
      %57 = arith.addf %55, %56 : vector<8x128xf32>
      %c0_21 = arith.constant 0 : index
      %c0_22 = arith.constant 0 : index
      %58 = vector.load %arg6[%c0_21, %c0_22] : memref<8x128xf32, #tpu.memory_space<vmem>>, vector<8x128xf32>
      %59 = arith.mulf %54, %58 : vector<8x128xf32>
      %60 = arith.mulf %57, %26 : vector<8x128xf32>
      %61 = arith.addf %59, %60 : vector<8x128xf32>
      %62 = math.tanh %61 : vector<8x128xf32>
      %63 = arith.mulf %32, %62 : vector<8x128xf32>
      %c0_23 = arith.constant 0 : index
      %c0_24 = arith.constant 0 : index
      %64 = vector.load %arg7[%c0_23, %c0_24] : memref<8x128xf32, #tpu.memory_space<vmem>>, vector<8x128xf32>
      tpu.vector_store %arg7[%c0_23, %c0_24], %63 {strides = array<i32>} : memref<8x128xf32, #tpu.memory_space<vmem>>, vector<8x128xf32>,
      %c0_25 = arith.constant 0 : index
      %c0_26 = arith.constant 0 : index
      %65 = vector.load %arg8[%c0_25, %c0_26] : memref<8x128xf32, #tpu.memory_space<vmem>>, vector<8x128xf32>
      tpu.vector_store %arg8[%c0_25, %c0_26], %61 {strides = array<i32>} : memref<8x128xf32, #tpu.memory_space<vmem>>, vector<8x128xf32>,
    } else {
    }
    return
  }
  func.func @transform_0(%arg0: i32, %arg1: i32) -> (i32, i32) {
    %c0_i32 = arith.constant 0 : i32
    return %arg0, %arg1 : i32, i32
  }
  func.func @transform_1(%arg0: i32, %arg1: i32) -> (i32, i32) {
    %c0_i32 = arith.constant 0 : i32
    %c0_i32_0 = arith.constant 0 : i32
    return %arg1, %c0_i32 : i32, i32
  }
  func.func @transform_2(%arg0: i32, %arg1: i32) -> (i32, i32) {
    %c0_i32 = arith.constant 0 : i32
    %c0_i32_0 = arith.constant 0 : i32
    %c0_i32_1 = arith.constant 0 : i32
    return %c0_i32, %c0_i32_0 : i32, i32
  }
  func.func @transform_3(%arg0: i32, %arg1: i32) -> (i32, i32) {
    %c0_i32 = arith.constant 0 : i32
    %c0_i32_0 = arith.constant 0 : i32
    %c0_i32_1 = arith.constant 0 : i32
    return %c0_i32, %c0_i32_0 : i32, i32
  }
  func.func @transform_4(%arg0: i32, %arg1: i32) -> (i32, i32) {
    %c0_i32 = arith.constant 0 : i32
    %c0_i32_0 = arith.constant 0 : i32
    return %arg0, %c0_i32 : i32, i32
  }
  func.func @transform_5(%arg0: i32, %arg1: i32) -> (i32, i32) {
    %c0_i32 = arith.constant 0 : i32
    %c0_i32_0 = arith.constant 0 : i32
    return %arg0, %c0_i32 : i32, i32
  }
  func.func @transform_6(%arg0: i32, %arg1: i32) -> (i32, i32) {
    %c0_i32 = arith.constant 0 : i32
    %c0_i32_0 = arith.constant 0 : i32
    return %arg0, %c0_i32 : i32, i32
  }
}

</mosaic_0001>

<bundles_post_ra>
// kernel: tpu_custom_call.1
= control target key start
LH: loop header
LB: loop body
LE: loop exit
PB: predicated region body
PF: predicated region fallthrough
CT: control target
= control target key end

     0   :  { %12 = vsyncpa [#allocation4], 0  ;;  %s1208_s0 = inlined_call_operand.hbm [shape: f32[8,192], index: 0, kind: input, shape index: {}]   ;;  %s1209_s1 = inlined_call_operand.hbm [shape: f32[192,768], index: 1, kind: input, shape index: {}]   ;;  %s1210_s2 = inlined_call_operand.vmem [shape: f32[1,768], index: 2, kind: input, shape index: {}]   ;;  %s1211_s3 = inlined_call_operand.hbm [shape: f32[128,128], index: 3, kind: input, shape index: {}]   ;;  %s1212_s4 = inlined_call_operand.vmem [shape: f32[8,128], index: 4, kind: input, shape index: {}]   ;;  %s1213_s5 = inlined_call_operand.hbm [shape: f32[8,128], index: 5, kind: output, shape index: {0}]   ;;  %s1214_s6 = inlined_call_operand.hbm [shape: f32[8,128], index: 6, kind: output, shape index: {1}]  }
   0x1   :  { %13 = vsyncpa [#allocation7], 0 }
   0x2   :  { %14 = vsyncpa [#allocation5], 0 }
   0x3   :  { %15 = vsyncpa [#allocation11], 0  ;;  %s1055_s21 = smov [#allocation6]   ;;  %s937_s25 = scalar_lea.hbm %s1209_s1, 18432 }
   0x4   :  { %s31_s22 = sshll.u32 %s1055_s21, 4  ;;  %p938_p0 = scmp.ne.s32.totalorder %s1209_s1, %s937_s25  ;;  %s32_s22 = int_to_ptr.vmem [resolvable:$true] %s31_s22 }
   0x5   :  { %p941_p1 = scmp.lt.u32.totalorder %s937_s25, %s1209_s1 }
   0x7   :  { %p943_p2 = pnand %p941_p1, %p938_p0 }
   0x9   :  { %946 = shalt.err (!%p943_p2)
}
   0xa   :  { %s947_s30 = scalar_lea.vmem %s32_s22, 18432  ;;  %p952_p4 = scmp.lt.s32.totalorder %s32_s22, %s32_s22 }
   0xb   :  { %p948_p3 = scmp.ne.s32.totalorder %s32_s22, %s947_s30  ;;  %p953_p5 = scmp.lt.s32.totalorder %s947_s30, %s947_s30 }
   0xd   :  { %p954_p6 = por %p953_p5, %p952_p4 }
   0xf   :  { %p955_p7 = pnand %p954_p6, %p948_p3 }
  0x11   :  { %958 = shalt.err (!%p955_p7)
}
  0x12   :  { %s1056_s7 = smov 768   ;;  %s1057_s8 = smov 48  }
  0x13   :  { %37 = dma.hbm_to_vmem [thread:$0]  %s1209_s1, 18432, %s32_s22, [#allocation7], %s1056_s7, %s1056_s7, %s1057_s8  }
  0x14   :  { %s1058_s11 = smov [#allocation3]   ;;  %s1059_s13 = smov [#allocation8]  }
  0x15   :  { %s22_s12 = sshll.u32 %s1058_s11, 4  ;;  %s45_s14 = sshll.u32 %s1059_s13, 4  ;;  %s23_s12 = int_to_ptr.vmem [resolvable:$true] %s22_s12  ;;  %s46_s14 = int_to_ptr.vmem [resolvable:$true] %s45_s14 }
  0x16   :  { %s959_s17 = scalar_lea.hbm %s1208_s0, 256 }
  0x17   :  { %p960_p8 = scmp.ne.s32.totalorder %s1208_s0, %s959_s17  ;;  %p963_p9 = scmp.lt.u32.totalorder %s959_s17, %s1208_s0 }
  0x19   :  { %p965_p10 = pnand %p963_p9, %p960_p8 }
  0x1b   :  { %968 = shalt.err (!%p965_p10)
}
  0x1c   :  { %s969_s1 = scalar_lea.vmem %s23_s12, 256  ;;  %p974_p12 = scmp.lt.s32.totalorder %s23_s12, %s23_s12 }
  0x1d   :  { %p970_p11 = scmp.ne.s32.totalorder %s23_s12, %s969_s1  ;;  %p975_p13 = scmp.lt.s32.totalorder %s969_s1, %s969_s1 }
  0x1f   :  { %p976_p0 = por %p975_p13, %p974_p12 }
  0x21   :  { %p977_p1 = pnand %p976_p0, %p970_p11 }
  0x23   :  { %980 = shalt.err (!%p977_p1)
}
  0x24   :  { %25 = dma.hbm_to_vmem [thread:$0]  %s1208_s0, 256, %s23_s12, [#allocation4]  }
  0x25   :  { %s981_s26 = scalar_lea.hbm %s1211_s3, 2048 }
  0x26   :  { %p982_p2 = scmp.ne.s32.totalorder %s1211_s3, %s981_s26  ;;  %p985_p3 = scmp.lt.u32.totalorder %s981_s26, %s1211_s3 }
  0x28   :  { %p987_p4 = pnand %p985_p3, %p982_p2 }
  0x2a   :  { %990 = shalt.err (!%p987_p4)
}
  0x2b   :  { %s991_s7 = scalar_lea.vmem %s46_s14, 2048  ;;  %p996_p6 = scmp.lt.s32.totalorder %s46_s14, %s46_s14 }
  0x2c   :  { %p992_p5 = scmp.ne.s32.totalorder %s46_s14, %s991_s7  ;;  %p997_p7 = scmp.lt.s32.totalorder %s991_s7, %s991_s7 }
  0x2e   :  { %p998_p8 = por %p997_p7, %p996_p6 }
  0x30   :  { %p999_p9 = pnand %p998_p8, %p992_p5 }
  0x32   :  { %1002 = shalt.err (!%p999_p9)
}
  0x33   :  { %s1060_s0 = smov 128   ;;  %s1061_s8 = smov 8  }
  0x34   :  { %51 = dma.hbm_to_vmem [thread:$0]  %s1211_s3, 2048, %s46_s14, [#allocation7], %s1060_s0, %s1060_s0, %s1061_s8  }
  0x35   :  { %1047 = dma.done.wait [#allocation4], 256  }
  0x36   :  { %1048 = vsyncadd [#allocation4], 4294967040 }
  0x37   :  { %1049 = dma.done.wait [#allocation7], 20480  }
  0x38   :  { %1050 = vsyncadd [#allocation7], 4294946816  ;;  %v114_v0 = vld [vmem:[#allocation6 + $0x8] sm:$0xff]  ;;  %v120_v1 = vld [vmem:[#allocation6 + $0x38] sm:$0xff]  ;;  %vm257_vm0 = vcmask 523264   ;;  %s1062_s13 = smov [#allocation10]  }
  0x39   :  { %v113_v2 = vld [vmem:[#allocation6] sm:$0xff]  ;;  %v728_v3 = vpack.c.bf16 %v120_v1, %v114_v0  ;;  %v119_v4 = vld [vmem:[#allocation6 + $0x30] sm:$0xff]  ;;  %v126_v5 = vld [vmem:[#allocation6 + $0x68] sm:$0xff]  ;;  %s655_s14 = sshll.u32 %s1062_s13, 4  ;;  %s656_s14 = int_to_ptr.vmem [resolvable:$true] %s655_s14 }
  0x3a   :  { %v132_v6 = vld [vmem:[#allocation6 + $0x98] sm:$0xff]  ;;  %v730_v7 = vpack.c.bf16 %v119_v4, %v113_v2  ;;  %v125_v9 = vld [vmem:[#allocation6 + $0x60] sm:$0xff]  ;;  %v131_v10 = vld [vmem:[#allocation6 + $0x90] sm:$0xff]  ;;  %s1003_s15 = scalar_lea.vmem %s656_s14, 128  ;;  %p1008_p11 = scmp.lt.s32.totalorder %s656_s14, %s656_s14 }
  0x3b   :  { %v732_v8 = vpack.c.bf16 %v132_v6, %v126_v5  ;;  %v138_v11 = vld [vmem:[#allocation6 + $0xc8] sm:$0xff]  ;;  %729 = vmatprep.subr.bf16.mxu0 %v728_v3  ;;  %v144_v12 = vld [vmem:[#allocation6 + $0xf8] sm:$0xff]  ;;  %v734_v13 = vpack.c.bf16 %v131_v10, %v125_v9  ;;  %v137_v15 = vld [vmem:[#allocation6 + $0xc0] sm:$0xff]  ;;  %p1004_p10 = scmp.ne.s32.totalorder %s656_s14, %s1003_s15  ;;  %p1009_p12 = scmp.lt.s32.totalorder %s1003_s15, %s1003_s15 }
  0x3c   :  { %731 = vmatpush1.bf16.msra.mxu0 %v730_v7  ;;  %v736_v14 = vpack.c.bf16 %v144_v12, %v138_v11  ;;  %v143_v16 = vld [vmem:[#allocation6 + $0xf0] sm:$0xff]  ;;  %v150_v17 = vld [vmem:[#allocation6 + $0x128] sm:$0xff]  ;;  %v156_v18 = vld [vmem:[#allocation6 + $0x158] sm:$0xff] }
  0x3d   :  { %733 = vmatprep.subr.bf16.mxu0 %v732_v8  ;;  %v738_v19 = vpack.c.bf16 %v143_v16, %v137_v15  ;;  %v740_v20 = vpack.c.bf16 %v156_v18, %v150_v17  ;;  %v149_v21 = vld [vmem:[#allocation6 + $0x120] sm:$0xff]  ;;  %v155_v22 = vld [vmem:[#allocation6 + $0x150] sm:$0xff]  ;;  %v162_v23 = vld [vmem:[#allocation6 + $0x188] sm:$0xff]  ;;  %p1010_p13 = por %p1009_p12, %p1008_p11 }
  0x3e   :  { %v168_v24 = vld [vmem:[#allocation6 + $0x1b8] sm:$0xff]  ;;  %v742_v25 = vpack.c.bf16 %v155_v22, %v149_v21  ;;  %v161_v27 = vld [vmem:[#allocation6 + $0x180] sm:$0xff]  ;;  %v167_v28 = vld [vmem:[#allocation6 + $0x1b0] sm:$0xff] }
  0x3f   :  { %v744_v26 = vpack.c.bf16 %v168_v24, %v162_v23  ;;  %v174_v29 = vld [vmem:[#allocation6 + $0x1e8] sm:$0xff]  ;;  %v180_v30 = vld [vmem:[#allocation6 + $0x218] sm:$0xff]  ;;  %v746_v31 = vpack.c.bf16 %v167_v28, %v161_v27  ;;  %v173_v34 = vld [vmem:[#allocation6 + $0x1e0] sm:$0xff]  ;;  %p1011_p0 = pnand %p1010_p13, %p1004_p10 }
  0x40   :  { %735 = vmatpush1.bf16.msra.mxu0 %v734_v13  ;;  %v1135_v32 = vld [vmem:[#allocation3 + $0x8] sm:$0xff]  ;;  %v748_v33 = vpack.c.bf16 %v180_v30, %v174_v29  ;;  %v179_v35 = vld [vmem:[#allocation6 + $0x210] sm:$0xff]  ;;  %v186_v36 = vld [vmem:[#allocation6 + $0x248] sm:$0xff] }
  0x41   :  { %737 = vmatprep.subr.bf16.mxu0 %v736_v14  ;;  %669 = vmatprep.mubr.msk.f32.mxu0 %vm257_vm0, %v1135_v32  ;;  %v192_v37 = vld [vmem:[#allocation6 + $0x278] sm:$0xff]  ;;  %v750_v38 = vpack.c.bf16 %v179_v35, %v173_v34  ;;  %v185_v40 = vld [vmem:[#allocation6 + $0x240] sm:$0xff]  ;;  %v191_v41 = vld [vmem:[#allocation6 + $0x270] sm:$0xff] }
  0x42   :  { %670 = vmatprep.mubr.msk.f32.mxu1 %vm257_vm0, %v1135_v32  ;;  %v752_v39 = vpack.c.bf16 %v192_v37, %v186_v36  ;;  %v198_v42 = vld [vmem:[#allocation6 + $0x2a8] sm:$0xff]  ;;  %v204_v43 = vld [vmem:[#allocation6 + $0x2d8] sm:$0xff]  ;;  %v754_v44 = vpack.c.bf16 %v191_v41, %v185_v40  ;;  %v197_v46 = vld [vmem:[#allocation6 + $0x2a0] sm:$0xff] }
  0x43   :  { %v756_v45 = vpack.c.bf16 %v204_v43, %v198_v42  ;;  %v203_v47 = vld [vmem:[#allocation6 + $0x2d0] sm:$0xff]  ;;  %v210_v48 = vld [vmem:[#allocation6 + $0x308] sm:$0xff]  ;;  %v216_v49 = vld [vmem:[#allocation6 + $0x338] sm:$0xff] }
  0x44   :  { %739 = vmatpush1.bf16.msra.mxu0 %v738_v19  ;;  %v758_v50 = vpack.c.bf16 %v203_v47, %v197_v46  ;;  %v760_v51 = vpack.c.bf16 %v216_v49, %v210_v48  ;;  %v209_v52 = vld [vmem:[#allocation6 + $0x300] sm:$0xff]  ;;  %v215_v53 = vld [vmem:[#allocation6 + $0x330] sm:$0xff]  ;;  %v222_v54 = vld [vmem:[#allocation6 + $0x368] sm:$0xff] }
  0x45   :  { %741 = vmatprep.subr.bf16.mxu0 %v740_v20  ;;  %v228_v55 = vld [vmem:[#allocation6 + $0x398] sm:$0xff]  ;;  %v762_v56 = vpack.c.bf16 %v215_v53, %v209_v52  ;;  %v221_v58 = vld [vmem:[#allocation6 + $0x360] sm:$0xff]  ;;  %v227_v59 = vld [vmem:[#allocation6 + $0x390] sm:$0xff] }
  0x46   :  { %v764_v57 = vpack.c.bf16 %v228_v55, %v222_v54  ;;  %v234_v60 = vld [vmem:[#allocation6 + $0x3c8] sm:$0xff]  ;;  %v240_v61 = vld [vmem:[#allocation6 + $0x3f8] sm:$0xff]  ;;  %v766_v62 = vpack.c.bf16 %v227_v59, %v221_v58  ;;  %v233_v0 = vld [vmem:[#allocation6 + $0x3c0] sm:$0xff] }
  0x47   :  { %v768_v63 = vpack.c.bf16 %v240_v61, %v234_v60  ;;  %v239_v1 = vld [vmem:[#allocation6 + $0x3f0] sm:$0xff]  ;;  %v246_v2 = vld [vmem:[#allocation6 + $0x428] sm:$0xff]  ;;  %v252_v3 = vld [vmem:[#allocation6 + $0x458] sm:$0xff] }
  0x48   :  { %743 = vmatpush1.bf16.msra.mxu0 %v742_v25  ;;  %v770_v4 = vpack.c.bf16 %v239_v1, %v233_v0  ;;  %v772_v5 = vpack.c.bf16 %v252_v3, %v246_v2  ;;  %v245_v6 = vld [vmem:[#allocation6 + $0x420] sm:$0xff]  ;;  %v251_v7 = vld [vmem:[#allocation6 + $0x450] sm:$0xff]  ;;  %v118_v8 = vld [vmem:[#allocation6 + $0x28] sm:$0xff] }
  0x49   :  { %745 = vmatprep.subr.bf16.mxu0 %v744_v26  ;;  %v124_v9 = vld [vmem:[#allocation6 + $0x58] sm:$0xff]  ;;  %v774_v10 = vpack.c.bf16 %v251_v7, %v245_v6  ;;  %v117_v12 = vld [vmem:[#allocation6 + $0x20] sm:$0xff]  ;;  %v123_v13 = vld [vmem:[#allocation6 + $0x50] sm:$0xff] }
  0x4a   :  { %v824_v11 = vpack.c.bf16 %v124_v9, %v118_v8  ;;  %v130_v14 = vld [vmem:[#allocation6 + $0x88] sm:$0xff]  ;;  %v136_v15 = vld [vmem:[#allocation6 + $0xb8] sm:$0xff]  ;;  %v1141_v16 = vld [vmem:[#allocation3] sm:$0xff]  ;;  %v826_v17 = vpack.c.bf16 %v123_v13, %v117_v12 }
  0x4b   :  { %v828_v18 = vpack.c.bf16 %v136_v15, %v130_v14  ;;  %v129_v19 = vld [vmem:[#allocation6 + $0x80] sm:$0xff]  ;;  %v135_v20 = vld [vmem:[#allocation6 + $0xb0] sm:$0xff]  ;;  %v142_v21 = vld [vmem:[#allocation6 + $0xe8] sm:$0xff] }
  0x4c   :  { %747 = vmatpush1.bf16.msra.mxu0 %v746_v31  ;;  %v148_v22 = vld [vmem:[#allocation6 + $0x118] sm:$0xff]  ;;  %v830_v23 = vpack.c.bf16 %v135_v20, %v129_v19  ;;  %v141_v25 = vld [vmem:[#allocation6 + $0xe0] sm:$0xff]  ;;  %v147_v26 = vld [vmem:[#allocation6 + $0x110] sm:$0xff] }
  0x4d   :  { %749 = vmatprep.subr.bf16.mxu0 %v748_v33  ;;  %v832_v24 = vpack.c.bf16 %v148_v22, %v142_v21  ;;  %v154_v27 = vld [vmem:[#allocation6 + $0x148] sm:$0xff]  ;;  %v160_v28 = vld [vmem:[#allocation6 + $0x178] sm:$0xff]  ;;  %v834_v29 = vpack.c.bf16 %v147_v26, %v141_v25  ;;  %v153_v31 = vld [vmem:[#allocation6 + $0x140] sm:$0xff]  ;;  %v69_v21 = vlaneseq }
  0x4e   :  { %v836_v30 = vpack.c.bf16 %v160_v28, %v154_v27  ;;  %v159_v33 = vld [vmem:[#allocation6 + $0x170] sm:$0xff]  ;;  %v166_v34 = vld [vmem:[#allocation6 + $0x1a8] sm:$0xff]  ;;  %v172_v35 = vld [vmem:[#allocation6 + $0x1d8] sm:$0xff] }
  0x4f   :  { %v838_v36 = vpack.c.bf16 %v159_v33, %v153_v31  ;;  %v840_v37 = vpack.c.bf16 %v172_v35, %v166_v34  ;;  %v184_v40 = vld [vmem:[#allocation6 + $0x238] sm:$0xff]  ;;  %v177_v43 = vld [vmem:[#allocation6 + $0x200] sm:$0xff]  ;;  %v1151_v22 = vshrl.u32 %v69_v21, 7  ;;  %v122_v34 = vld [vmem:[#allocation6 + $0x48] sm:$0xff] }
  0x50   :  { %751 = vmatpush1.bf16.msra.mxu0 %v750_v38  ;;  %v165_v38 = vld [vmem:[#allocation6 + $0x1a0] sm:$0xff]  ;;  %v196_v46 = vld [vmem:[#allocation6 + $0x298] sm:$0xff]  ;;  %v115_v35 = vld [vmem:[#allocation6 + $0x10] sm:$0xff] }
  0x51   :  { %753 = vmatprep.subr.bf16.mxu0 %v752_v39  ;;  %v178_v39 = vld [vmem:[#allocation6 + $0x208] sm:$0xff]  ;;  %v189_v49 = vld [vmem:[#allocation6 + $0x260] sm:$0xff]  ;;  %v208_v52 = vld [vmem:[#allocation6 + $0x2f8] sm:$0xff]  ;;  %v91_v26 = vsub.s32 5, %v1151_v22 }
  0x52   :  { %v844_v42 = vpack.c.bf16 %v184_v40, %v178_v39  ;;  %v201_v55 = vld [vmem:[#allocation6 + $0x2c0] sm:$0xff]  ;;  %v220_v58 = vld [vmem:[#allocation6 + $0x358] sm:$0xff] }
  0x53   :  { %v213_v61 = vld [vmem:[#allocation6 + $0x320] sm:$0xff]  ;;  %v232_v0 = vld [vmem:[#allocation6 + $0x3b8] sm:$0xff] }
  0x54   :  { %755 = vmatpush1.bf16.msra.mxu0 %v754_v44  ;;  %v183_v44 = vld [vmem:[#allocation6 + $0x230] sm:$0xff]  ;;  %v225_v3 = vld [vmem:[#allocation6 + $0x380] sm:$0xff]  ;;  %v244_v6 = vld [vmem:[#allocation6 + $0x418] sm:$0xff] }
  0x55   :  { %757 = vmatprep.subr.bf16.mxu0 %v756_v45  ;;  %v190_v45 = vld [vmem:[#allocation6 + $0x268] sm:$0xff]  ;;  %v846_v47 = vpack.c.bf16 %v183_v44, %v177_v43  ;;  %v237_v9 = vld [vmem:[#allocation6 + $0x3e0] sm:$0xff]  ;;  %v256_v12 = vld [vmem:[#allocation6 + $0x478] sm:$0xff] }
  0x56   :  { %v848_v48 = vpack.c.bf16 %v196_v46, %v190_v45  ;;  %v249_v15 = vld [vmem:[#allocation6 + $0x440] sm:$0xff]  ;;  %v116_v33 = vld [vmem:[#allocation6 + $0x18] sm:$0xff]  ;;  %v146_v44 = vld [vmem:[#allocation6 + $0x108] sm:$0xff] }
  0x57   :  { %v140_v43 = vld [vmem:[#allocation6 + $0xd8] sm:$0xff] }
  0x58   :  { %759 = vmatpush1.bf16.msra.mxu0 %v758_v50  ;;  %v195_v50 = vld [vmem:[#allocation6 + $0x290] sm:$0xff]  ;;  %v784_v46 = vpack.c.bf16 %v146_v44, %v140_v43 }
  0x59   :  { %761 = vmatprep.subr.bf16.mxu0 %v760_v51  ;;  %v202_v51 = vld [vmem:[#allocation6 + $0x2c8] sm:$0xff]  ;;  %v850_v53 = vpack.c.bf16 %v195_v50, %v189_v49  ;;  %v152_v49 = vld [vmem:[#allocation6 + $0x138] sm:$0xff]  ;;  %v247_v44 = vld [vmem:[#allocation6 + $0x430] sm:$0xff] }
  0x5a   :  { %v852_v54 = vpack.c.bf16 %v208_v52, %v202_v51  ;;  %v158_v50 = vld [vmem:[#allocation6 + $0x168] sm:$0xff] }
  0x5b   :  { %v788_v52 = vpack.c.bf16 %v158_v50, %v152_v49  ;;  %v534_v50 = vld [vmem:[#allocation8 + $0x10] sm:$0xff] }
  0x5c   :  { %763 = vmatpush1.bf16.msra.mxu0 %v762_v56  ;;  %v207_v56 = vld [vmem:[#allocation6 + $0x2f0] sm:$0xff] }
  0x5d   :  { %765 = vmatprep.subr.bf16.mxu0 %v764_v57  ;;  %v214_v57 = vld [vmem:[#allocation6 + $0x328] sm:$0xff]  ;;  %v854_v59 = vpack.c.bf16 %v207_v56, %v201_v55  ;;  %v164_v55 = vld [vmem:[#allocation6 + $0x198] sm:$0xff] }
  0x5e   :  { %v856_v60 = vpack.c.bf16 %v220_v58, %v214_v57  ;;  %v170_v56 = vld [vmem:[#allocation6 + $0x1c8] sm:$0xff] }
  0x5f   :  { %v792_v58 = vpack.c.bf16 %v170_v56, %v164_v55  ;;  %v538_v56 = vld [vmem:[#allocation8 + $0x30] sm:$0xff] }
  0x60   :  { %767 = vmatpush1.bf16.msra.mxu0 %v766_v62  ;;  %v219_v62 = vld [vmem:[#allocation6 + $0x350] sm:$0xff] }
  0x61   :  { %769 = vmatprep.subr.bf16.mxu0 %v768_v63  ;;  %v226_v63 = vld [vmem:[#allocation6 + $0x388] sm:$0xff]  ;;  %v858_v1 = vpack.c.bf16 %v219_v62, %v213_v61  ;;  %v176_v61 = vld [vmem:[#allocation6 + $0x1f8] sm:$0xff] }
  0x62   :  { %v860_v2 = vpack.c.bf16 %v232_v0, %v226_v63  ;;  %v182_v62 = vld [vmem:[#allocation6 + $0x228] sm:$0xff] }
  0x63   :  { %v796_v0 = vpack.c.bf16 %v182_v62, %v176_v61 }
  0x64   :  { %771 = vmatpush1.bf16.msra.mxu0 %v770_v4  ;;  %v231_v4 = vld [vmem:[#allocation6 + $0x3b0] sm:$0xff] }
  0x65   :  { %773 = vmatprep.subr.bf16.mxu0 %v772_v5  ;;  %v238_v5 = vld [vmem:[#allocation6 + $0x3e8] sm:$0xff]  ;;  %v862_v7 = vpack.c.bf16 %v231_v4, %v225_v3  ;;  %v188_v3 = vld [vmem:[#allocation6 + $0x258] sm:$0xff] }
  0x66   :  { %v864_v8 = vpack.c.bf16 %v244_v6, %v238_v5  ;;  %v194_v4 = vld [vmem:[#allocation6 + $0x288] sm:$0xff] }
  0x67   :  { %v800_v6 = vpack.c.bf16 %v194_v4, %v188_v3  ;;  %v541_v3 = vld [vmem:[#allocation8 + $0x48] sm:$0xff] }
  0x68   :  { %775 = vmatpush1.bf16.msra.mxu0 %v774_v10  ;;  %v243_v10 = vld [vmem:[#allocation6 + $0x410] sm:$0xff] }
  0x69   :  { %825 = vmatprep.subr.bf16.mxu0 %v824_v11  ;;  %v250_v11 = vld [vmem:[#allocation6 + $0x448] sm:$0xff]  ;;  %v866_v13 = vpack.c.bf16 %v243_v10, %v237_v9  ;;  %v200_v9 = vld [vmem:[#allocation6 + $0x2b8] sm:$0xff] }
  0x6a   :  { %v868_v14 = vpack.c.bf16 %v256_v12, %v250_v11  ;;  %v206_v10 = vld [vmem:[#allocation6 + $0x2e8] sm:$0xff] }
  0x6b   :  { %326 = vmatmul.mubr.f32.vlgmr.msra.gmra.mrb[0].mxu0 %v1141_v16  ;;  %v804_v12 = vpack.c.bf16 %v206_v10, %v200_v9  ;;  %v546_v9 = vld [vmem:[#allocation8 + $0x70] sm:$0xff] }
  0x6c   :  { %827 = vmatpush1.bf16.msra.mxu0 %v826_v17  ;;  %671 = vmatprep.mubr.msk.f32.mxu0 %vm257_vm0, %v1135_v32  ;;  %v171_v32 = vld [vmem:[#allocation6 + $0x1d0] sm:$0xff] }
  0x6d   :  { %829 = vmatprep.subr.bf16.mxu0 %v828_v18  ;;  %v842_v41 = vpack.c.bf16 %v171_v32, %v165_v38  ;;  %v255_v17 = vld [vmem:[#allocation6 + $0x470] sm:$0xff]  ;;  %v128_v38 = vld [vmem:[#allocation6 + $0x78] sm:$0xff]  ;;  %v134_v32 = vld [vmem:[#allocation6 + $0xa8] sm:$0xff] }
  0x6e   :  { %v870_v18 = vpack.c.bf16 %v255_v17, %v249_v15  ;;  %v780_v40 = vpack.c.bf16 %v134_v32, %v128_v38  ;;  %v212_v15 = vld [vmem:[#allocation6 + $0x318] sm:$0xff]  ;;  %v218_v17 = vld [vmem:[#allocation6 + $0x348] sm:$0xff]  ;;  %v235_v32 = vld [vmem:[#allocation6 + $0x3d0] sm:$0xff] }
  0x6f   :  { %v808_v21 = vpack.c.bf16 %v218_v17, %v212_v15 }
  0x70   :  { %831 = vmatpush1.bf16.msra.mxu0 %v830_v23  ;;  %v87_v23 = vsub.s32 4, %v1151_v22 }
  0x71   :  { %833 = vmatprep.subr.bf16.mxu0 %v832_v24  ;;  %v1157_v24 = vld [vmem:[%s1210_s2] sm:$0x3f] }
  0x72   :  { %v88_v25 = vrot.slane %v1157_v24, %v87_v23  ;;  %v211_v23 = vld [vmem:[#allocation6 + $0x310] sm:$0xff] }
  0x74   :  { %835 = vmatpush1.bf16.msra.mxu0 %v834_v29  ;;  %v92_v29 = vrot.slane %v1157_v24, %v91_v26  ;;  %v224_v26 = vld [vmem:[#allocation6 + $0x378] sm:$0xff] }
  0x75   :  { %837 = vmatprep.subr.bf16.mxu0 %v836_v30 }
  0x78   :  { %839 = vmatpush1.bf16.msra.mxu0 %v838_v36  ;;  %v776_v36 = vpack.c.bf16 %v122_v34, %v116_v33  ;;  %v223_v33 = vld [vmem:[#allocation6 + $0x370] sm:$0xff]  ;;  %v229_v34 = vld [vmem:[#allocation6 + $0x3a0] sm:$0xff] }
  0x79   :  { %841 = vmatprep.subr.bf16.mxu0 %v840_v37  ;;  %v121_v37 = vld [vmem:[#allocation6 + $0x40] sm:$0xff] }
  0x7a   :  { %v778_v39 = vpack.c.bf16 %v121_v37, %v115_v35  ;;  %777 = vmatprep.subr.bf16.mxu1 %v776_v36  ;;  %v236_v35 = vld [vmem:[#allocation6 + $0x3d8] sm:$0xff]  ;;  %v242_v36 = vld [vmem:[#allocation6 + $0x408] sm:$0xff]  ;;  %v814_v37 = vpack.c.bf16 %v229_v34, %v223_v33 }
  0x7b   :  { %v816_v38 = vpack.c.bf16 %v242_v36, %v236_v35  ;;  %v83_v36 = vsub.s32 3, %v1151_v22 }
  0x7c   :  { %843 = vmatpush1.bf16.msra.mxu0 %v842_v41  ;;  %v127_v41 = vld [vmem:[#allocation6 + $0x70] sm:$0xff]  ;;  %779 = vmatpush1.bf16.msra.mxu1 %v778_v39  ;;  %v241_v39 = vld [vmem:[#allocation6 + $0x400] sm:$0xff] }
  0x7d   :  { %845 = vmatprep.subr.bf16.mxu0 %v844_v42  ;;  %v133_v42 = vld [vmem:[#allocation6 + $0xa0] sm:$0xff]  ;;  %781 = vmatprep.subr.bf16.mxu1 %v780_v40  ;;  %v248_v40 = vld [vmem:[#allocation6 + $0x438] sm:$0xff] }
  0x7e   :  { %v782_v45 = vpack.c.bf16 %v133_v42, %v127_v41  ;;  %v254_v41 = vld [vmem:[#allocation6 + $0x468] sm:$0xff]  ;;  %v818_v42 = vpack.c.bf16 %v241_v39, %v235_v32  ;;  %v79_v32 = vsub.s32 2, %v1151_v22 }
  0x7f   :  { %v820_v43 = vpack.c.bf16 %v254_v41, %v248_v40 }
  0x80   :  { %847 = vmatpush1.bf16.msra.mxu0 %v846_v47  ;;  %v139_v47 = vld [vmem:[#allocation6 + $0xd0] sm:$0xff]  ;;  %783 = vmatpush1.bf16.msra.mxu1 %v782_v45  ;;  %v253_v45 = vld [vmem:[#allocation6 + $0x460] sm:$0xff] }
  0x81   :  { %849 = vmatprep.subr.bf16.mxu0 %v848_v48  ;;  %v145_v48 = vld [vmem:[#allocation6 + $0x100] sm:$0xff]  ;;  %785 = vmatprep.subr.bf16.mxu1 %v784_v46 }
  0x82   :  { %v786_v51 = vpack.c.bf16 %v145_v48, %v139_v47  ;;  %v532_v46 = vld [vmem:[#allocation8] sm:$0xff]  ;;  %v533_v47 = vld [vmem:[#allocation8 + $0x8] sm:$0xff]  ;;  %v822_v48 = vpack.c.bf16 %v253_v45, %v247_v44 }
  0x83   :  { %v872_v49 = vpack.c.bf16 %v533_v47, %v532_v46 }
  0x84   :  { %851 = vmatpush1.bf16.msra.mxu0 %v850_v53  ;;  %v151_v53 = vld [vmem:[#allocation6 + $0x130] sm:$0xff]  ;;  %787 = vmatpush1.bf16.msra.mxu1 %v786_v51  ;;  %v535_v51 = vld [vmem:[#allocation8 + $0x18] sm:$0xff] }
  0x85   :  { %853 = vmatprep.subr.bf16.mxu0 %v852_v54  ;;  %v157_v54 = vld [vmem:[#allocation6 + $0x160] sm:$0xff]  ;;  %789 = vmatprep.subr.bf16.mxu1 %v788_v52  ;;  %v876_v52 = vpack.c.bf16 %v535_v51, %v534_v50 }
  0x86   :  { %v790_v57 = vpack.c.bf16 %v157_v54, %v151_v53  ;;  %v536_v53 = vld [vmem:[#allocation8 + $0x20] sm:$0xff]  ;;  %v537_v54 = vld [vmem:[#allocation8 + $0x28] sm:$0xff] }
  0x87   :  { %v880_v55 = vpack.c.bf16 %v537_v54, %v536_v53 }
  0x88   :  { %855 = vmatpush1.bf16.msra.mxu0 %v854_v59  ;;  %v163_v59 = vld [vmem:[#allocation6 + $0x190] sm:$0xff]  ;;  %791 = vmatpush1.bf16.msra.mxu1 %v790_v57  ;;  %v539_v57 = vld [vmem:[#allocation8 + $0x38] sm:$0xff] }
  0x89   :  { %857 = vmatprep.subr.bf16.mxu0 %v856_v60  ;;  %v169_v60 = vld [vmem:[#allocation6 + $0x1c0] sm:$0xff]  ;;  %793 = vmatprep.subr.bf16.mxu1 %v792_v58  ;;  %v884_v58 = vpack.c.bf16 %v539_v57, %v538_v56 }
  0x8a   :  { %v794_v63 = vpack.c.bf16 %v169_v60, %v163_v59 }
  0x8c   :  { %859 = vmatpush1.bf16.msra.mxu0 %v858_v1  ;;  %v175_v1 = vld [vmem:[#allocation6 + $0x1f0] sm:$0xff]  ;;  %795 = vmatpush1.bf16.msra.mxu1 %v794_v63 }
  0x8d   :  { %861 = vmatprep.subr.bf16.mxu0 %v860_v2  ;;  %v181_v2 = vld [vmem:[#allocation6 + $0x220] sm:$0xff]  ;;  %797 = vmatprep.subr.bf16.mxu1 %v796_v0 }
  0x8e   :  { %v798_v5 = vpack.c.bf16 %v181_v2, %v175_v1  ;;  %v540_v2 = vld [vmem:[#allocation8 + $0x40] sm:$0xff] }
  0x8f   :  { %v888_v4 = vpack.c.bf16 %v541_v3, %v540_v2 }
  0x90   :  { %863 = vmatpush1.bf16.msra.mxu0 %v862_v7  ;;  %v187_v7 = vld [vmem:[#allocation6 + $0x250] sm:$0xff]  ;;  %799 = vmatpush1.bf16.msra.mxu1 %v798_v5 }
  0x91   :  { %865 = vmatprep.subr.bf16.mxu0 %v864_v8  ;;  %v193_v8 = vld [vmem:[#allocation6 + $0x280] sm:$0xff]  ;;  %801 = vmatprep.subr.bf16.mxu1 %v800_v6  ;;  %v542_v5 = vld [vmem:[#allocation8 + $0x50] sm:$0xff]  ;;  %v543_v6 = vld [vmem:[#allocation8 + $0x58] sm:$0xff] }
  0x92   :  { %v802_v11 = vpack.c.bf16 %v193_v8, %v187_v7  ;;  %v892_v7 = vpack.c.bf16 %v543_v6, %v542_v5  ;;  %v545_v8 = vld [vmem:[#allocation8 + $0x68] sm:$0xff] }
  0x94   :  { %867 = vmatpush1.bf16.msra.mxu0 %v866_v13  ;;  %v199_v13 = vld [vmem:[#allocation6 + $0x2b0] sm:$0xff]  ;;  %803 = vmatpush1.bf16.msra.mxu1 %v802_v11 }
  0x95   :  { %869 = vmatprep.subr.bf16.mxu0 %v868_v14  ;;  %v205_v14 = vld [vmem:[#allocation6 + $0x2e0] sm:$0xff]  ;;  %805 = vmatprep.subr.bf16.mxu1 %v804_v12 }
  0x98   :  { %871 = vmatpush1.bf16.msra.mxu0 %v870_v18  ;;  %v806_v18 = vpack.c.bf16 %v205_v14, %v199_v13 }
  0x9a   :  { %807 = vmatpush1.bf16.msra.mxu1 %v806_v18 }
  0x9b   :  { %468 = vmatmul.mubr.f32.vlgmr.msra.gmra.mrb[2].mxu0 %v1141_v16  ;;  %809 = vmatprep.subr.bf16.mxu1 %v808_v21 }
 0x13e   :  { %v1147_v19 = vpop.f32.mrb[0].mxu0 }
 0x13f   :  { %v1149_v20 = vpop.f32.mrb[1].mxu0 }
 0x16e   :  { %v469_v27 = vpop.f32.mrb[2].mxu0 }
 0x16f   :  { %v1161_v28 = vadd.f32 %v469_v27, %v88_v25  ;;  %v471_v30 = vpop.f32.mrb[3].mxu0  ;;  %v217_v25 = vld [vmem:[#allocation6 + $0x340] sm:$0xff]  ;;  %v230_v27 = vld [vmem:[#allocation6 + $0x3a8] sm:$0xff] }
 0x170   :  { %v1165_v31 = vadd.f32 %v471_v30, %v92_v29  ;;  %v810_v29 = vpack.c.bf16 %v217_v25, %v211_v23  ;;  %v812_v30 = vpack.c.bf16 %v230_v27, %v224_v26  ;;  %v71_v25 = vsub.s32 0, %v1151_v22 }
 0x171   :  { %514 = vmax.xlane.f32.xlu0 %v1161_v28  ;;  %v75_v26 = vsub.s32 1, %v1151_v22 }
 0x172   :  { %811 = vmatpush1.bf16.msra.mxu1 %v810_v29  ;;  %v72_v27 = vrot.slane %v1157_v24, %v71_v25 }
 0x173   :  { %813 = vmatprep.subr.bf16.mxu1 %v812_v30  ;;  %v76_v29 = vrot.slane %v1157_v24, %v75_v26 }
 0x174   :  { %v474_v30 = vadd.f32 %v1147_v19, %v72_v27 }
 0x175   :  { %516 = vmax.xlane.f32.xlu0 %v1165_v31  ;;  %v475_v33 = vadd.f32 %v1149_v20, %v76_v29 }
 0x176   :  { %815 = vmatpush1.bf16.msra.mxu1 %v814_v37  ;;  %v672_v34 = vmul.f32 -1.442695, %v474_v30  ;;  %v84_v37 = vrot.slane %v1157_v24, %v83_v36 }
 0x177   :  { %817 = vmatprep.subr.bf16.mxu1 %v816_v38  ;;  %v673_v35 = vmul.f32 -1.442695, %v475_v33 }
 0x17a   :  { %819 = vmatpush1.bf16.msra.mxu1 %v818_v42 }
 0x17b   :  { %821 = vmatprep.subr.bf16.mxu1 %v820_v43  ;;  %v80_v43 = vrot.slane %v1157_v24, %v79_v32  ;;  %v631_v24 = vld [vmem:[%s1212_s4] sm:$0xff] }
 0x17e   :  { %823 = vmatpush1.bf16.msra.mxu1 %v822_v48 }
 0x17f   :  { %873 = vmatprep.subr.bf16.mxu1 %v872_v49 }
 0x181   :  { %397 = vmatmul.mubr.f32.vlgmr.msra.gmra.mrb[0].mxu1 %v1141_v16 }
 0x182   :  { %875 = vmatpush3.bf16.msra.mxu1 %v872_v49 }
 0x183   :  { %877 = vmatprep.subr.bf16.mxu1 %v876_v52 }
 0x186   :  { %879 = vmatpush3.bf16.msra.mxu1 %v876_v52 }
 0x187   :  { %881 = vmatprep.subr.bf16.mxu1 %v880_v55 }
 0x18a   :  { %883 = vmatpush3.bf16.msra.mxu1 %v880_v55 }
 0x18b   :  { %885 = vmatprep.subr.bf16.mxu1 %v884_v58 }
 0x18e   :  { %887 = vmatpush3.bf16.msra.mxu1 %v884_v58 }
 0x18f   :  { %889 = vmatprep.subr.bf16.mxu1 %v888_v4 }
 0x192   :  { %891 = vmatpush3.bf16.msra.mxu1 %v888_v4 }
 0x193   :  { %893 = vmatprep.subr.bf16.mxu1 %v892_v7 }
 0x196   :  { %895 = vmatpush3.bf16.msra.mxu1 %v892_v7 }
 0x1fe   :  { %v515_v59 = vpop.xlane.xlu0 %514 }
 0x1ff   :  { %v518_v60 = vsub.f32 %v1161_v28, %v515_v59  ;;  %v544_v28 = vld [vmem:[#allocation8 + $0x60] sm:$0xff] }
 0x200   :  { %v896_v10 = vpack.c.bf16 %v545_v8, %v544_v28 }
 0x201   :  { %v520_v61 = vmul.f32 1.442695, %v518_v60 }
 0x202   :  { %v517_v62 = vpop.xlane.xlu0 %516  ;;  %897 = vmatprep.subr.bf16.mxu1 %v896_v10 }
 0x203   :  { %913 = vpow2.f32 %v520_v61  ;;  %v519_v63 = vsub.f32 %v1165_v31, %v517_v62  ;;  %v547_v31 = vld [vmem:[#allocation8 + $0x78] sm:$0xff]  ;;  %899 = vmatpush3.bf16.msra.mxu1 %v896_v10 }
 0x204   :  { %v900_v11 = vpack.c.bf16 %v547_v31, %v546_v9 }
 0x205   :  { %v522_v16 = vmul.f32 1.442695, %v519_v63 }
 0x206   :  { %901 = vmatprep.subr.bf16.mxu1 %v900_v11 }
 0x207   :  { %915 = vpow2.f32 %v522_v16  ;;  %903 = vmatpush3.bf16.msra.mxu1 %v900_v11 }
 0x20d   :  { %v914_v0 = vpop.eup %913 }
 0x20e   :  { %524 = vadd.xlane.f32.xlu1 %v914_v0 }
 0x211   :  { %v916_v1 = vpop.eup %915 }
 0x212   :  { %526 = vadd.xlane.f32.xlu1 %v916_v1 }
 0x254   :  { %v398_v12 = vpop.f32.mrb[0].mxu1 }
 0x255   :  { %v400_v13 = vpop.f32.mrb[1].mxu1  ;;  %v476_v20 = vadd.f32 %v398_v12, %v80_v43 }
 0x256   :  { %v477_v40 = vadd.f32 %v400_v13, %v84_v37 }
 0x258   :  { %v674_v19 = vmul.f32 -1.442695, %v477_v40 }
 0x29b   :  { %v525_v14 = vpop.xlane.xlu1 %524 }
 0x29c   :  { %917 = vrcp.f32 %v525_v14 }
 0x29f   :  { %v527_v15 = vpop.xlane.xlu1 %526 }
 0x2a0   :  { %919 = vrcp.f32 %v527_v15 }
 0x2a1   :  { %921 = vpow2.f32 %v672_v34 }
 0x2a2   :  { %923 = vpow2.f32 %v673_v35 }
 0x2a6   :  { %v918_v17 = vpop.eup %917 }
 0x2a7   :  { %v529_v18 = vmul.f32 %v918_v17, %v914_v0 }
 0x2a9   :  { %725 = vmatprep.mubr.f32.mxu1 %v529_v18 }
 0x2aa   :  { %v920_v21 = vpop.eup %919 }
 0x2ab   :  { %v531_v23 = vmul.f32 %v920_v21, %v916_v1  ;;  %v922_v38 = vpop.eup %921 }
 0x2ac   :  { %v924_v39 = vpop.eup %923  ;;  %v498_v41 = vadd.f32 1.0, %v922_v38 }
 0x2ad   :  { %726 = vmatmul.mubr.f32.vlgmr.msra.gmra.mrb[2].mxu1 %v531_v23  ;;  %v504_v42 = vadd.f32 1.0, %v924_v39 }
 0x2ae   :  { %925 = vrcp.f32 %v498_v41 }
 0x2af   :  { %927 = vrcp.f32 %v504_v42 }
 0x2b0   :  { %929 = vpow2.f32 %v674_v19 }
 0x2b1   :  { %931 = vtanh.f32 %v476_v20 }
 0x2b8   :  { %v926_v47 = vpop.eup %925 }
 0x2b9   :  { %v928_v49 = vpop.eup %927 }
 0x2ba   :  { %v930_v50 = vpop.eup %929 }
 0x2bb   :  { %v932_v56 = vpop.eup %931  ;;  %v511_v57 = vadd.f32 1.0, %v930_v50 }
 0x2bd   :  { %933 = vrcp.f32 %v511_v57 }
 0x380   :  { %v727_v44 = vpop.f32.mrb[2].mxu1 }
 0x381   :  { %v623_v45 = vsub.f32 1.0, %v727_v44  ;;  %v614_v46 = vpop.f32.mrb[3].mxu1 }
 0x383   :  { %v624_v48 = vmul.f32 %v623_v45, %v614_v46 }
 0x385   :  { %v625_v22 = vmul.f32 %v928_v49, %v624_v48  ;;  %v626_v51 = vsub.f32 %v614_v46, %v624_v48  ;;  %v628_v52 = vmul.f32 %v926_v47, %v624_v48  ;;  %v629_v53 = vsub.f32 %v623_v45, %v624_v48 }
 0x387   :  { %v627_v54 = vadd.f32 %v626_v51, %v625_v22  ;;  %v630_v55 = vadd.f32 %v629_v53, %v628_v52 }
 0x389   :  { %v632_v58 = vmul.f32 %v631_v24, %v627_v54  ;;  %v633_v59 = vmul.f32 %v932_v56, %v630_v55 }
 0x38b   :  { %v634_v60 = vadd.f32 %v633_v59, %v632_v58 }
 0x38d   :  { %935 = vtanh.f32 %v634_v60  ;;  %638 = vst [vmem:[#allocation10] sm:$0xff] %v634_v60 }
 0x38e   :  { %1014 = shalt.err (!%p1011_p0)
}
 0x38f   :  { %s1015_s17 = scalar_lea.hbm %s1214_s6, 128 }
 0x390   :  { %p1016_p1 = scmp.ne.s32.totalorder %s1214_s6, %s1015_s17  ;;  %p1019_p2 = scmp.lt.u32.totalorder %s1015_s17, %s1214_s6 }
 0x392   :  { %p1021_p3 = pnand %p1019_p2, %p1016_p1 }
 0x394   :  { %1024 = shalt.err (!%p1021_p3)
}
 0x395   :  { %658 = dma.vmem_to_hbm [thread:$0]  %s656_s14, 128, %s1214_s6, [#allocation11]   ;;  %v934_v61 = vpop.eup %933 }
 0x396   :  { %s1063_s23 = smov [#allocation9]  }
 0x397   :  { %s645_s24 = sshll.u32 %s1063_s23, 4  ;;  %v936_v62 = vpop.eup %935  ;;  %s646_s24 = int_to_ptr.vmem [resolvable:$true] %s645_s24 }
 0x398   :  { %v636_v63 = vmul.f32 %v936_v62, %v934_v61  ;;  %s1025_s25 = scalar_lea.vmem %s646_s24, 128  ;;  %p1030_p5 = scmp.lt.s32.totalorder %s646_s24, %s646_s24 }
 0x399   :  { %p1026_p4 = scmp.ne.s32.totalorder %s646_s24, %s1025_s25  ;;  %p1031_p6 = scmp.lt.s32.totalorder %s1025_s25, %s1025_s25 }
 0x39a   :  { %637 = vst [vmem:[#allocation9] sm:$0xff] %v636_v63 }
 0x39b   :  { %p1032_p7 = por %p1031_p6, %p1030_p5 }
 0x39d   :  { %p1033_p8 = pnand %p1032_p7, %p1026_p4 }
 0x39f   :  { %1036 = shalt.err (!%p1033_p8)
}
 0x3a0   :  { %s1037_s28 = scalar_lea.hbm %s1213_s5, 128 }
 0x3a1   :  { %p1038_p9 = scmp.ne.s32.totalorder %s1213_s5, %s1037_s28  ;;  %p1041_p10 = scmp.lt.u32.totalorder %s1037_s28, %s1213_s5 }
 0x3a3   :  { %p1043_p11 = pnand %p1041_p10, %p1038_p9 }
 0x3a5   :  { %1046 = shalt.err (!%p1043_p11)
}
 0x3a6   :  { %648 = dma.vmem_to_hbm [thread:$0]  %s646_s24, 128, %s1213_s5, [#allocation5]  }
 0x3a7   :  { %1051 = dma.done.wait [#allocation5], 128  }
 0x3a8   :  { %1052 = vsyncadd [#allocation5], 4294967168 }
 0x3a9   :  { %1053 = dma.done.wait [#allocation11], 128  }
 0x3aa   :  { %1054 = vsyncadd [#allocation11], 4294967168 }
 0x3ab   :  { %665 = vsyncpa [#allocation4], 1 }
 0x3ac   :  { %666 = vsyncpa [#allocation7], 1 }
 0x3ad   :  { %667 = vsyncpa [#allocation5], 1 }
 0x3ae   :  { %668 = vsyncpa [#allocation11], 1 }

</bundles_post_ra>
